<compile_context>
chip_gen: v6e
topology: v6e:2x2x1
jax: 0.10.0
libtpu: 0.0.40
codegen_flags: <defaults>
</compile_context>

<pallas_src>
import jax
import jax.numpy as jnp
from jax.experimental import pallas as pl
from jax.experimental.pallas import tpu as pltpu

IN_DIM = 71
H1, H2 = 49, 26
CAR_OUT = 3
CHOOSE_IN = IN_DIM + 2 * CAR_OUT          # 77

LANE = 128
SLAB_LANES = 2 * LANE                     # 256-wide slab (for the W1||CW1X merge)
BIAS_ROWS = 8                             # one (8,256) tile holding all biases
ROW_B1, ROW_B2, ROW_B3, ROW_CB2, ROW_CB3 = 0, 1, 2, 3, 4
N_WBLOCKS = 3                             # [W1|CW1X], [W2|W3], [CW2|CW3]
SLAB_ROWS = BIAS_ROWS + N_WBLOCKS * LANE  # 392 (multiple of 8)
CH0 = 2 * CAR_OUT                         # lane offset of the choose-L1 block (=6)


# ---------------------------------------------------------------------------
# Kernel: one grid step = one batch tile.  Everything VMEM-resident.
# Lane layouts (per row):
#   r1  : [main-h1 0:49 | boost-h1 49:98 | pad || x@cw1x at 128+6:128+55]
#   h2  : [main 0:26 | boost 26:52 | 0]
#   z   : [y1 0:3 | y2 3:6 | choose-L1 pre-act (minus x part) 6:55 | 0 | y2 125:128]
#   sel : [choose logit 0 | 0 ...]
# The y2 copy at lanes 125:128 makes the pltpu.roll-based select independent of
# rotation-direction convention (either direction lands y2 in lanes 0:3).
# ---------------------------------------------------------------------------
def _boosted_kernel(x_ref, p_ref, out_ref):
    x = x_ref[...]                                   # (TILE_B, 128), zero-padded

    bias_tile = p_ref[0:BIAS_ROWS, :]                # single (8, 256) tile
    b1 = bias_tile[ROW_B1:ROW_B1 + 1, 0:LANE]
    b2 = bias_tile[ROW_B2:ROW_B2 + 1, 0:LANE]
    b3 = bias_tile[ROW_B3:ROW_B3 + 1, 0:LANE]
    cb2 = bias_tile[ROW_CB2:ROW_CB2 + 1, 0:LANE]
    cb3 = bias_tile[ROW_CB3:ROW_CB3 + 1, 0:LANE]

    def wblk(i):                                     # i-th 128x256 weight block
        off = BIAS_ROWS + i * LANE
        return p_ref[off:off + LANE, :]

    w1big = wblk(0)                                  # [W1(main|boost) | CW1X]
    w23 = wblk(1)                                    # [W2 | W3 (+choose fold)]
    wc23 = wblk(2)                                   # [CW2 | CW3]

    def dot(a, b):
        return jnp.dot(a, b, preferred_element_type=jnp.float32)

    # Fused layer 1 (main + boost + choose-x) in one 256-wide MXU pass.
    r1 = dot(x, w1big)                               # (TILE_B, 256)
    h1 = jnp.maximum(r1[:, 0:LANE] + b1, 0.0)
    xc = r1[:, LANE:2 * LANE]                        # x @ cw1x at lanes 6:55

    # Fused main+boost layers 2/3 (block-diagonal) with choose-L1 folded in.
    h2 = jnp.maximum(dot(h1, w23[:, 0:LANE]) + b2, 0.0)
    z = dot(h2, w23[:, LANE:2 * LANE]) + b3          # y1 | y2 | choose-pre | y2

    # ChooseModel tail (sigmoid replaced by sign test on the logit).
    hc = jnp.maximum(z + xc, 0.0)                    # lanes 0:6,125:128 ignored by CW2
    hc2 = jnp.maximum(dot(hc, wc23[:, 0:LANE]) + cb2, 0.0)
    sel = dot(hc2, wc23[:, LANE:2 * LANE]) + cb3     # lane 0 = choose logit

    # `if sigmoid(logit) > 0.5: y1 else: y2`  ==  `logit > 0 ? y1 : y2`
    gate = sel[:, 0:1] > 0.0                         # lane-wise predicate, no scalar hop
    z_alt = pltpu.roll(z, shift=LANE - CAR_OUT, axis=1)  # y2 into lanes 0:3
    out_ref[...] = jnp.where(gate, z, z_alt).astype(out_ref.dtype)


# ---------------------------------------------------------------------------
# Wrappers
# ---------------------------------------------------------------------------
def boosted_model_forward_batched(xb, slab, *, tile_b=128):
    """xb: (B, 71) f32, slab: (392, 256) packed params -> (B, 3) f32.

    tile_b: batch rows per grid step (multiple of 8).  128 is a good default;
    use 256 on v6e/v7x for full MXU width if B is large.
    """
    assert tile_b % 8 == 0
    B = xb.shape[0]
    n_tiles = pl.cdiv(B, tile_b)
    b_pad = n_tiles * tile_b

    x_pad = jnp.zeros((b_pad, LANE), jnp.float32)
    x_pad = x_pad.at[:B, :IN_DIM].set(xb.astype(jnp.float32))

    flops = 2 * b_pad * (LANE * SLAB_LANES + 4 * LANE * LANE)
    bytes_accessed = (int(slab.size) * 4 + int(x_pad.size) * 4 + b_pad * LANE * 4)

    out = pl.pallas_call(
        _boosted_kernel,
        out_shape=jax.ShapeDtypeStruct((b_pad, LANE), jnp.float32),
        grid=(n_tiles,),
        in_specs=[
            pl.BlockSpec((tile_b, LANE), lambda i: (i, 0)),
            # Constant block index -> slab DMA'd once, VMEM-resident across tiles.
            pl.BlockSpec((SLAB_ROWS, SLAB_LANES), lambda i: (0, 0)),
        ],
        out_specs=pl.BlockSpec((tile_b, LANE), lambda i: (i, 0)),
        compiler_params=pltpu.CompilerParams(
            dimension_semantics=("parallel",)),   # megacore sharding on v7x
        cost_estimate=pl.CostEstimate(
            flops=flops, transcendentals=0, bytes_accessed=bytes_accessed),
    )(x_pad, slab)
    return out[:B, :CAR_OUT]


def boosted_model_forward(x, slab):
    """Single-sample forward matching the original module: x (71,) -> (3,)."""
    return boosted_model_forward_batched(x.reshape(1, IN_DIM), slab, tile_b=8)[0]


# ---------------------------------------------------------------------------
# Parameter construction (PyTorch nn.Linear default init:
# U(-1/sqrt(fan_in), 1/sqrt(fan_in)) for weight and bias) and host-side packing.
# ---------------------------------------------------------------------------
def _init_linear(key, fan_in, fan_out):
    kw, kb = jax.random.split(key)
    bound = 1.0 / jnp.sqrt(jnp.float32(fan_in))
    w = jax.random.uniform(kw, (fan_in, fan_out), jnp.float32, -bound, bound)
    b = jax.random.uniform(kb, (fan_out,), jnp.float32, -bound, bound)
    return w, b


def make_params(key):
    keys = jax.random.split(key, 9)
    mw1, mb1 = _init_linear(keys[0], IN_DIM, H1)      # main CarVecModel
    mw2, mb2 = _init_linear(keys[1], H1, H2)
    mw3, mb3 = _init_linear(keys[2], H2, CAR_OUT)
    bw1, bb1 = _init_linear(keys[3], IN_DIM, H1)      # boost CarVecModel
    bw2, bb2 = _init_linear(keys[4], H1, H2)
    bw3, bb3 = _init_linear(keys[5], H2, CAR_OUT)
    cw1, cb1 = _init_linear(keys[6], CHOOSE_IN, H1)   # ChooseModel
    cw2, cb2 = _init_linear(keys[7], H1, H2)
    cw3, cb3 = _init_linear(keys[8], H2, 1)
    return (mw1, mb1, mw2, mb2, mw3, mb3,
            bw1, bb1, bw2, bb2, bw3, bb3,
            cw1, cb1, cw2, cb2, cw3, cb3)


def pack_params(params):
    """Build the single (392, 256) f32 slab with fused / folded weights."""
    (mw1, mb1, mw2, mb2, mw3, mb3,
     bw1, bb1, bw2, bb2, bw3, bb3,
     cw1, cb1, cw2, cb2, cw3, cb3) = params

    cw1x = cw1[:IN_DIM]                        # (71, 49)  acts on x
    cw1a = cw1[IN_DIM:IN_DIM + CAR_OUT]        # (3, 49)   acts on y1
    cw1b = cw1[IN_DIM + CAR_OUT:]              # (3, 49)   acts on y2

    zmat = jnp.zeros((LANE, SLAB_LANES), jnp.float32)
    zrow = jnp.zeros((SLAB_LANES,), jnp.float32)

    # Block 0: fused layer 1 [main | boost] plus CW1X in the upper 128 lanes.
    W1BIG = (zmat
             .at[:IN_DIM, 0:H1].set(mw1)
             .at[:IN_DIM, H1:2 * H1].set(bw1)
             .at[:IN_DIM, LANE + CH0:LANE + CH0 + H1].set(cw1x))
    B1 = zrow.at[0:H1].set(mb1).at[H1:2 * H1].set(bb1)

    # Block 1: [W2 (block-diag) | W3 (block-diag) + folded choose-L1].
    W23 = (zmat
           .at[0:H1, 0:H2].set(mw2)
           .at[H1:2 * H1, H2:2 * H2].set(bw2)
           .at[0:H2, LANE:LANE + CAR_OUT].set(mw3)
           .at[H2:2 * H2, LANE + CAR_OUT:LANE + 2 * CAR_OUT].set(bw3)
           .at[0:H2, LANE + CH0:LANE + CH0 + H1].set(mw3 @ cw1a)
           .at[H2:2 * H2, LANE + CH0:LANE + CH0 + H1].set(bw3 @ cw1b)
           # y2 duplicated at output lanes 125:128 -> roll-direction agnostic select
           .at[H2:2 * H2, 2 * LANE - CAR_OUT:2 * LANE].set(bw3))
    B2 = zrow.at[0:H2].set(mb2).at[H2:2 * H2].set(bb2)
    B3 = (zrow
          .at[0:CAR_OUT].set(mb3)
          .at[CAR_OUT:2 * CAR_OUT].set(bb3)
          .at[CH0:CH0 + H1].set(mb3 @ cw1a + bb3 @ cw1b + cb1)
          .at[LANE - CAR_OUT:LANE].set(bb3))

    # Block 2: [CW2 (rows aligned to hc lane layout) | CW3].
    WC23 = (zmat
            .at[CH0:CH0 + H1, 0:H2].set(cw2)
            .at[0:H2, LANE:LANE + 1].set(cw3))
    CB2 = zrow.at[0:H2].set(cb2)
    CB3 = zrow.at[0:1].set(cb3)

    slab = jnp.zeros((SLAB_ROWS, SLAB_LANES), jnp.float32)
    slab = (slab.at[ROW_B1].set(B1).at[ROW_B2].set(B2).at[ROW_B3].set(B3)
                .at[ROW_CB2].set(CB2).at[ROW_CB3].set(CB3))
    for i, W in enumerate((W1BIG, W23, WC23)):
        off = BIAS_ROWS + i * LANE
        slab = slab.at[off:off + LANE].set(W)
    return slab


# ---------------------------------------------------------------------------
# Pure-JAX reference matching the original (un-fused) module semantics.
# ---------------------------------------------------------------------------
def reference_forward(x, params):
    (mw1, mb1, mw2, mb2, mw3, mb3,
     bw1, bb1, bw2, bb2, bw3, bb3,
     cw1, cb1, cw2, cb2, cw3, cb3) = params
    x2 = x.reshape(1, IN_DIM)

    def mlp(w1, b1, w2, b2, w3, b3):
        h = jnp.maximum(x2 @ w1 + b1, 0.0)
        h = jnp.maximum(h @ w2 + b2, 0.0)
        return h @ w3 + b3

    y1 = mlp(mw1, mb1, mw2, mb2, mw3, mb3)
    y2 = mlp(bw1, bb1, bw2, bb2, bw3, bb3)
    cat = jnp.concatenate([x2, y1, y2], axis=1)            # (1, 77)
    h = jnp.maximum(cat @ cw1 + cb1, 0.0)
    h = jnp.maximum(h @ cw2 + cb2, 0.0)
    b = jax.nn.sigmoid(h @ cw3 + cb3)
    return jnp.where(b[0, 0] > 0.5, y1, y2).reshape(CAR_OUT)


if __name__ == "__main__":
    key = jax.random.PRNGKey(0)
    kx, kp = jax.random.split(key)
    B = 20
    xb = jax.random.normal(kx, (B, IN_DIM), jnp.float32)
    params = make_params(kp)
    slab = pack_params(params)

    # Batched path: 3 grid steps of 8 rows, slab loaded once and kept resident.
    out = boosted_model_forward_batched(xb, slab, tile_b=8)
    out = jax.block_until_ready(out)

    ref = jnp.stack([reference_forward(xb[i], params) for i in range(B)])
    if not bool(jnp.allclose(out, ref, atol=1e-4, rtol=1e-4)):
        raise AssertionError(f"batched mismatch:\n pallas={out}\n ref={ref}")

    # Single-sample path (matches the original module's forward signature).
    out1 = jax.block_until_ready(boosted_model_forward(xb[0], slab))
    if not bool(jnp.allclose(out1, ref[0], atol=1e-4, rtol=1e-4)):
        raise AssertionError(f"single mismatch: pallas={out1} ref={ref[0]}")

    print("KERNEL_OK")
</pallas_src>

<mosaic_0001>
module attributes {stable_mosaic.version = 11 : i64} {
  func.func @_boosted_kernel(%arg0: i32, %arg1: memref<8x128xf32, #tpu.memory_space<vmem>>, %arg2: memref<392x256xf32, #tpu.memory_space<vmem>>, %arg3: memref<8x128xf32, #tpu.memory_space<vmem>>) attributes {dimension_semantics = [#tpu.dimension_semantics<parallel>], iteration_bounds = array<i64: 3>, scalar_prefetch = 0 : i64, scratch_operands = 0 : i64, tpu.core_type = #tpu.core_type<tc>, window_params = [{transform_indices = @transform_0, window_bounds = array<i64: 8, 128>}, {pipeline_mode = #tpu.pipeline_mode<synchronous>, transform_indices = @transform_1, window_bounds = array<i64: 392, 256>}, {transform_indices = @transform_2, window_bounds = array<i64: 8, 128>}]} {
    %c0 = arith.constant 0 : index
    %c0_0 = arith.constant 0 : index
    %0 = vector.load %arg1[%c0, %c0_0] : memref<8x128xf32, #tpu.memory_space<vmem>>, vector<8x128xf32>
    %c0_1 = arith.constant 0 : index
    %c0_2 = arith.constant 0 : index
    %1 = vector.load %arg2[%c0_1, %c0_2] : memref<392x256xf32, #tpu.memory_space<vmem>>, vector<8x256xf32>
    %2 = vector.extract_strided_slice %1 {offsets = [0, 0], sizes = [1, 128], strides = [1, 1]} : vector<8x256xf32> to vector<1x128xf32>
    %3 = vector.extract_strided_slice %1 {offsets = [1, 0], sizes = [1, 128], strides = [1, 1]} : vector<8x256xf32> to vector<1x128xf32>
    %4 = vector.extract_strided_slice %1 {offsets = [2, 0], sizes = [1, 128], strides = [1, 1]} : vector<8x256xf32> to vector<1x128xf32>
    %5 = vector.extract_strided_slice %1 {offsets = [3, 0], sizes = [1, 128], strides = [1, 1]} : vector<8x256xf32> to vector<1x128xf32>
    %6 = vector.extract_strided_slice %1 {offsets = [4, 0], sizes = [1, 128], strides = [1, 1]} : vector<8x256xf32> to vector<1x128xf32>
    %c8 = arith.constant 8 : index
    %c0_3 = arith.constant 0 : index
    %7 = vector.load %arg2[%c8, %c0_3] : memref<392x256xf32, #tpu.memory_space<vmem>>, vector<128x256xf32>
    %c136 = arith.constant 136 : index
    %c0_4 = arith.constant 0 : index
    %8 = vector.load %arg2[%c136, %c0_4] : memref<392x256xf32, #tpu.memory_space<vmem>>, vector<128x256xf32>
    %c264 = arith.constant 264 : index
    %c0_5 = arith.constant 0 : index
    %9 = vector.load %arg2[%c264, %c0_5] : memref<392x256xf32, #tpu.memory_space<vmem>>, vector<128x256xf32>
    %cst = arith.constant dense<0.000000e+00> : vector<8x256xf32>
    %10 = tpu.matmul %0, %7, %cst {dimension_numbers = #tpu.dot_dimension_numbers<[1], [0], [0], [1], [0, 0, 1, 1], [], []>} : vector<8x128xf32>, vector<128x256xf32>, vector<8x256xf32> -> vector<8x256xf32>
    %11 = vector.extract_strided_slice %10 {offsets = [0, 0], sizes = [8, 128], strides = [1, 1]} : vector<8x256xf32> to vector<8x128xf32>
    %12 = vector.broadcast %2 : vector<1x128xf32> to vector<8x128xf32>
    %13 = arith.addf %11, %12 : vector<8x128xf32>
    %cst_6 = arith.constant 0.000000e+00 : f32
    %14 = vector.broadcast %cst_6 : f32 to vector<8x128xf32>
    %15 = arith.maximumf %13, %14 : vector<8x128xf32>
    %16 = vector.extract_strided_slice %10 {offsets = [0, 128], sizes = [8, 128], strides = [1, 1]} : vector<8x256xf32> to vector<8x128xf32>
    %17 = vector.extract_strided_slice %8 {offsets = [0, 0], sizes = [128, 128], strides = [1, 1]} : vector<128x256xf32> to vector<128x128xf32>
    %cst_7 = arith.constant dense<0.000000e+00> : vector<8x128xf32>
    %18 = tpu.matmul %15, %17, %cst_7 {dimension_numbers = #tpu.dot_dimension_numbers<[1], [0], [0], [1], [0, 0, 1, 1], [], []>} : vector<8x128xf32>, vector<128x128xf32>, vector<8x128xf32> -> vector<8x128xf32>
    %19 = vector.broadcast %3 : vector<1x128xf32> to vector<8x128xf32>
    %20 = arith.addf %18, %19 : vector<8x128xf32>
    %cst_8 = arith.constant 0.000000e+00 : f32
    %21 = vector.broadcast %cst_8 : f32 to vector<8x128xf32>
    %22 = arith.maximumf %20, %21 : vector<8x128xf32>
    %23 = vector.extract_strided_slice %8 {offsets = [0, 128], sizes = [128, 128], strides = [1, 1]} : vector<128x256xf32> to vector<128x128xf32>
    %cst_9 = arith.constant dense<0.000000e+00> : vector<8x128xf32>
    %24 = tpu.matmul %22, %23, %cst_9 {dimension_numbers = #tpu.dot_dimension_numbers<[1], [0], [0], [1], [0, 0, 1, 1], [], []>} : vector<8x128xf32>, vector<128x128xf32>, vector<8x128xf32> -> vector<8x128xf32>
    %25 = vector.broadcast %4 : vector<1x128xf32> to vector<8x128xf32>
    %26 = arith.addf %24, %25 : vector<8x128xf32>
    %27 = arith.addf %26, %16 : vector<8x128xf32>
    %cst_10 = arith.constant 0.000000e+00 : f32
    %28 = vector.broadcast %cst_10 : f32 to vector<8x128xf32>
    %29 = arith.maximumf %27, %28 : vector<8x128xf32>
    %30 = vector.extract_strided_slice %9 {offsets = [0, 0], sizes = [128, 128], strides = [1, 1]} : vector<128x256xf32> to vector<128x128xf32>
    %cst_11 = arith.constant dense<0.000000e+00> : vector<8x128xf32>
    %31 = tpu.matmul %29, %30, %cst_11 {dimension_numbers = #tpu.dot_dimension_numbers<[1], [0], [0], [1], [0, 0, 1, 1], [], []>} : vector<8x128xf32>, vector<128x128xf32>, vector<8x128xf32> -> vector<8x128xf32>
    %32 = vector.broadcast %5 : vector<1x128xf32> to vector<8x128xf32>
    %33 = arith.addf %31, %32 : vector<8x128xf32>
    %cst_12 = arith.constant 0.000000e+00 : f32
    %34 = vector.broadcast %cst_12 : f32 to vector<8x128xf32>
    %35 = arith.maximumf %33, %34 : vector<8x128xf32>
    %36 = vector.extract_strided_slice %9 {offsets = [0, 128], sizes = [128, 128], strides = [1, 1]} : vector<128x256xf32> to vector<128x128xf32>
    %cst_13 = arith.constant dense<0.000000e+00> : vector<8x128xf32>
    %37 = tpu.matmul %35, %36, %cst_13 {dimension_numbers = #tpu.dot_dimension_numbers<[1], [0], [0], [1], [0, 0, 1, 1], [], []>} : vector<8x128xf32>, vector<128x128xf32>, vector<8x128xf32> -> vector<8x128xf32>
    %38 = vector.broadcast %6 : vector<1x128xf32> to vector<8x128xf32>
    %39 = arith.addf %37, %38 : vector<8x128xf32>
    %40 = vector.extract_strided_slice %39 {offsets = [0, 0], sizes = [8, 1], strides = [1, 1]} : vector<8x128xf32> to vector<8x1xf32>
    %cst_14 = arith.constant 0.000000e+00 : f32
    %41 = vector.broadcast %cst_14 : f32 to vector<8x1xf32>
    %42 = arith.cmpf ogt, %40, %41 : vector<8x1xf32>
    %c125_i32 = arith.constant 125 : i32
    %43 = tpu.dynamic_rotate %26 by %c125_i32 dim 1 : vector<8x128xf32>, i32 -> vector<8x128xf32>
    %44 = vector.shape_cast %42 : vector<8x1xi1> to vector<8x1xi1>
    %45 = vector.broadcast %44 : vector<8x1xi1> to vector<8x128xi1>
    %46 = arith.select %45, %26, %43 : vector<8x128xi1>, vector<8x128xf32>
    %c0_15 = arith.constant 0 : index
    %c0_16 = arith.constant 0 : index
    %47 = vector.load %arg3[%c0_15, %c0_16] : memref<8x128xf32, #tpu.memory_space<vmem>>, vector<8x128xf32>
    tpu.vector_store %arg3[%c0_15, %c0_16], %46 {strides = array<i32>} : memref<8x128xf32, #tpu.memory_space<vmem>>, vector<8x128xf32>,
    return
  }
  func.func @transform_0(%arg0: i32) -> (i32, i32) {
    %c0_i32 = arith.constant 0 : i32
    %c0_i32_0 = arith.constant 0 : i32
    return %arg0, %c0_i32 : i32, i32
  }
  func.func @transform_1(%arg0: i32) -> (i32, i32) {
    %c0_i32 = arith.constant 0 : i32
    %c0_i32_0 = arith.constant 0 : i32
    %c0_i32_1 = arith.constant 0 : i32
    return %c0_i32, %c0_i32_0 : i32, i32
  }
  func.func @transform_2(%arg0: i32) -> (i32, i32) {
    %c0_i32 = arith.constant 0 : i32
    %c0_i32_0 = arith.constant 0 : i32
    return %arg0, %c0_i32 : i32, i32
  }
}

</mosaic_0001>

<bundles_post_ra>
// kernel: tpu_custom_call.1
= control target key start
LH: loop header
LB: loop body
LE: loop exit
PB: predicated region body
PF: predicated region fallthrough
CT: control target
= control target key end

     0   :  { %7 = vsyncpa [#allocation3], 0  ;;  %s1439_s0 = inlined_call_operand.hbm [shape: f32[24,128], index: 0, kind: input, shape index: {}]   ;;  %s1440_s1 = inlined_call_operand.hbm [shape: f32[392,256], index: 1, kind: input, shape index: {}]   ;;  %s1441_s2 = inlined_call_operand.hbm [shape: f32[24,128], index: 2, kind: output, shape index: {}]  }
   0x1   :  { %9 = vsyncpa [#allocation3 + $0x1], 0 }
   0x2   :  { %10 = vsyncpa [#allocation6], 0 }
   0x3   :  { %11 = vsyncpa [#allocation4], 0 }
   0x4   :  { %13 = vsyncpa [#allocation4 + $0x1], 0  ;;  %s1187_s9 = smov 0   ;;  %s1189_s10 = smov 0  }
   0x5   :  { %s1191_s11 = smov 0   ;;  %s1193_s12 = smov 0  }
   0x6 LB: > { %s1208_s13 = sadd.s32 4294967295, %s1161_s12   ;;  %s753_s14 = sadd.s32 4294967294, %s1161_s12   ;;  %s1161_s12 = sphi %s1193_s12, %s1462_s12   ;;  %s1157_s11 = sphi %s1191_s11, %s1461_s11   ;;  %s1153_s10 = sphi %s1189_s10, %s1460_s10   ;;  %s1149_s9 = sphi %s1187_s9, %s1459_s9  }
   0x7   : > { %p39_p0 = scmp.ne.s32.totalorder %s1153_s10, %s1149_s9  ;;  %p1442_p1 = scmp.eq.s32.totalorder %s1208_s13, 0 }
   0x8   : > { %p90_p3 = scmp.eq.s32.totalorder %s753_s14, 2  ;;  %p754_p5 = scmp.ge.s32.totalorder %s1161_s12, 1 }
   0x9   : > { %p1217_p4 = por %p1442_p1, %p39_p0  ;;  %p97_p7 = scmp.lt.s32.totalorder %s1161_s12, 4 }
   0xa   : > { %p1222_p6 = por %p90_p3, %p39_p0  ;;  %s1163_s18 = smov [#allocation5]  }
   0xb   : > { %s1446_s15 = scalar_select %p1217_p4, 1, 0 }
   0xc   : > { %s1447_s16 = scalar_select %p1222_p6, 1, 0 }
   0xd   : > { %p1227_p8 = pnand %p754_p5, %p97_p7  ;;  %s109_s19 = sshll.u32 %s1163_s18, 4  ;;  %s110_s19 = int_to_ptr.vmem [resolvable:$true] %s109_s19 }
   0xe   : > { %s1240_s21 = sadd.s32 1, %s1161_s12   ;;  %s26_s22 = sadd.s32 1, %s1157_s11 }
   0xf   : > { %s1448_s17 = scalar_select %p1227_p8, 1, 0 }
  0x10   : > { %p983_p9 = pneg %p1227_p8  ;;  %s23_s23 = ssub.s32 %s1161_s12, %s1240_s21 }
  0x11   : > { %s1050_s24 = scalar_lea.vmem %s110_s19, 12544  ;;  %p1058_p3 = scmp.lt.s32.totalorder %s110_s19, %s110_s19 }
  0x12   : > { %p1235_p10 = pnand %p983_p9, %p1442_p1  ;;  %p1051_p12 = scmp.ne.s32.totalorder %s110_s19, %s1050_s24 }
  0x13   : > { %p1059_p5 = scmp.lt.s32.totalorder %s1050_s24, %s1050_s24 }
  0x14   : > { %p1041_p11 = pneg %p1235_p10 }
  0x15   : > { %p1060_p7 = por %p1059_p5, %p1058_p3 }
  0x16   : > { %p1053_p13 = pnand %p1051_p12, %p1041_p11 }
  0x18   : > { %p1054_p0 = pneg %p1053_p13 }
  0x1a   : > { %p1061_p2 = pnand %p1060_p7, %p1054_p0 }
  0x1c   : > { %1064 = shalt.err (!%p1061_p2)
}
  0x1d   : > { %s1164_s25 = smov 256   ;;  %s1165_s26 = smov 16  }
  0x1e   : > { %986 = dma.hbm_to_vmem [thread:$0]  (!%p1235_p10), %s1440_s1, 12544, %s110_s19, [#allocation6], %s1164_s25, %s1164_s25, %s1165_s26  }
  0x1f   : > { %p24_p9 = scmp.eq.s32.totalorder %s23_s23, 0  ;;  %p33_p11 = scmp.ne.s32.totalorder %s1157_s11, %s1153_s10 }
  0x20   : > { %p34_p12 = scmp.eq.s32.totalorder %s1161_s12, 0  ;;  %p996_p2 = scmp.lt.s32.totalorder %s1161_s12, 3 }
  0x21   : > { %s1257_s29 = scalar_select %p24_p9, %s1157_s11, %s26_s22  }
  0x22   : > { %p35_p13 = por %p34_p12, %p33_p11  ;;  %p1450_p0 = scmp.eq.s32.totalorder %s1208_s13, 2 }
  0x23   : > { %s123_s3 = sand.u32 1, %s1157_s11   ;;  %s758_s4 = sshll.u32 %s1161_s12, 7 }
  0x24   : > { %p1261_p3 = por %p1450_p0, %p33_p11  ;;  %s757_s5 = sshll.u32 %s123_s3, 3 }
  0x25   : > { %s1270_s8 = scalar_lea.hbm %s1439_s0, %s758_s4  ;;  %s127_s14 = scalar_lea.vmem [#allocation2], %s757_s5 }
  0x26   : > { %s1451_s30 = scalar_select %p1261_p3, 1, 0 }
  0x27   : > { %s134_s18 = sshll.u32 %s127_s14, 4  ;;  %p1272_p10 = pnand %p996_p2, %p35_p13  ;;  %s135_s18 = int_to_ptr.vmem [resolvable:$true] %s134_s18 }
  0x28   : > { %s124_s20 = scalar_lea.sflag [#allocation3], %s123_s3  ;;  %s1065_s22 = scalar_lea.hbm %s1270_s8, 128 }
  0x29   : > { %p1066_p5 = scmp.ne.s32.totalorder %s1270_s8, %s1065_s22  ;;  %p1067_p7 = pneg %p1272_p10 }
  0x2a   : > { %s1070_s25 = scalar_lea.hbm %s1439_s0, 384  ;;  %p1071_p12 = scmp.lt.s32.totalorder %s1270_s8, %s1439_s0 }
  0x2b   : > { %p1068_p9 = pnand %p1067_p7, %p1066_p5  ;;  %p1072_p2 = scmp.lt.s32.totalorder %s1070_s25, %s1065_s22 }
  0x2d   : > { %p1069_p11 = pneg %p1068_p9  ;;  %p1073_p13 = por %p1072_p2, %p1071_p12 }
  0x2f   : > { %p1074_p0 = pnand %p1073_p13, %p1069_p11 }
  0x31   : > { %1077 = shalt.err (!%p1074_p0)
}
  0x32   : > { %s1078_s28 = scalar_lea.vmem %s135_s18, 128  ;;  %s1166_s3 = smov [#allocation2]  }
  0x33   : > { %p1079_p1 = scmp.ne.s32.totalorder %s135_s18, %s1078_s28  ;;  %s1083_s4 = sshll.u32 %s1166_s3, 4  ;;  %s1084_s4 = int_to_ptr.vmem [resolvable:$false] %s1083_s4 }
  0x34   : > { %s1085_s5 = scalar_lea.vmem %s1084_s4, 256  ;;  %p1086_p5 = scmp.lt.s32.totalorder %s135_s18, %s1084_s4 }
  0x35   : > { %p1081_p6 = pnand %p1079_p1, %p1067_p7  ;;  %p1087_p9 = scmp.lt.s32.totalorder %s1085_s5, %s1078_s28 }
  0x37   : > { %p1082_p3 = pneg %p1081_p6  ;;  %p1088_p4 = por %p1087_p9, %p1086_p5 }
  0x39   : > { %p1089_p8 = pnand %p1088_p4, %p1082_p3 }
  0x3b   : > { %1092 = shalt.err (!%p1089_p8)
}
  0x3c   : > { %990 = dma.hbm_to_vmem [thread:$0]  (!%p1272_p10), %s1270_s8, 128, %s135_s18, %s124_s20  }
  0x3d   : > { %p1453_p11 = scmp.ne.s32.totalorder %s1448_s17, 0 }
  0x3e   : > { %s1293_s6 = sand.u32 (!%p1453_p11), 1, %s1153_s10   ;;  %p1454_p1 = scmp.ne.s32.totalorder (!%p1453_p11), %s1446_s15, 0 }
  0x3f   : > { %143 = sbr.rel (%p1453_p11) target bundleno = 1235 (0x4d3), region = 28  ;;  %s760_s7 = sshll.u32 (!%p1453_p11), %s1293_s6, 3 }
  0x40   : > { %s146_s14 = scalar_lea.sflag (!%p1453_p11), [#allocation3], %s1293_s6  ;;  %s1299_s22 = scalar_lea.vmem (!%p1453_p11), [#allocation2], %s760_s7 }
  0x44   : > { %1136 = dma.done.wait (%p1454_p1), %s146_s14, 128  }
  0x45   : > { %1138 = vsyncadd (%p1454_p1), %s146_s14, 4294967168  ;;  %p1455_p4 = scmp.eq.s32.totalorder %s1208_s13, 0 }
  0x47   : > { %1140 = dma.done.wait (%p1455_p4), [#allocation6], 12544   ;;  %p1456_p6 = pmov %p1455_p4 }
  0x48   : > { %v1167_v0 = vmov 0.0   ;;  %v207_v1 = vld [vmem:[#allocation5 + $0x108] sm:$0xff]  ;;  %v206_v2 = vld [vmem:[#allocation5 + $0x100] sm:$0xff]  ;;  %v205_v3 = vld [vmem:[#allocation5 + $0xf8] sm:$0xff]  ;;  %vm1168_vm0 = vmmov 0   ;;  %v343_v63 = vlaneseq  ;;  %s1170_s15 = smov 125  }
  0x49   : > { %1142 = vsyncadd (%p1456_p6), [#allocation6], 4294954752  ;;  %336 = vmatprep.mubr.f32.mxu0 %v1167_v0  ;;  %835 = vmatprep.subr.mxu1 %v1167_v0  ;;  %v204_v4 = vld [vmem:[#allocation5 + $0xf0] sm:$0xff]  ;;  %v203_v5 = vld [vmem:[#allocation5 + $0xe8] sm:$0xff]  ;;  %s764_s17 = sshll.u32 %s1208_s13, 7  ;;  %s173_s8 = scalar_lea.vmem [#allocation7], %s760_s7 }
  0x4a   : > { %272 = vmatprep.subr.mxu0 %v207_v1  ;;  %v202_v6 = vld [vmem:[#allocation5 + $0xe0] sm:$0xff]  ;;  %v201_v7 = vld [vmem:[#allocation5 + $0xd8] sm:$0xff]  ;;  %v200_v8 = vld [vmem:[#allocation5 + $0xd0] sm:$0xff]  ;;  %867 = vmatprep.mubr.msk.f32.mxu1 %vm1168_vm0, %v1167_v0  ;;  %v1346_v1 = vshrl.u32 %v343_v63, 7  ;;  %v1169_v63 = vmov 0   ;;  %s673_s18 = sshll.u32 %s173_s8, 4  ;;  %s1403_s23 = scalar_lea.hbm %s1441_s2, %s764_s17  ;;  %s674_s18 = int_to_ptr.vmem [resolvable:$true] %s673_s18 }
  0x4b   : > { %273 = vmatpush1.msra.mxu0 %v206_v2  ;;  %v199_v9 = vld [vmem:[#allocation5 + $0xc8] sm:$0xff]  ;;  %v198_v10 = vld [vmem:[#allocation5 + $0xc0] sm:$0xff]  ;;  %v197_v11 = vld [vmem:[#allocation5 + $0xb8] sm:$0xff]  ;;  %1038 = vset.pattern.permute.xlu0 %v1169_v63  ;;  %s660_s24 = scalar_lea.sflag [#allocation4], %s1293_s6  ;;  %s1093_s25 = scalar_lea.vmem %s674_s18, 128 }
  0x4c   : > { %274 = vmatprep.subr.mxu0 %v205_v3  ;;  %v196_v12 = vld [vmem:[#allocation5 + $0xb0] sm:$0xff]  ;;  %v195_v13 = vld [vmem:[#allocation5 + $0xa8] sm:$0xff]  ;;  %v194_v14 = vld [vmem:[#allocation5 + $0xa0] sm:$0xff]  ;;  %v345_v2 = vsub.s32 0, %v1346_v1  ;;  %p1094_p8 = scmp.ne.s32.totalorder %s674_s18, %s1093_s25  ;;  %p1457_p3 = scmp.ne.s32.totalorder %s1451_s30, 0 }
  0x4d   : > { %275 = vmatpush1.msra.mxu0 %v204_v4  ;;  %v238_v15 = vld [vmem:[#allocation5 + $0x200] sm:$0xff]  ;;  %v236_v16 = vld [vmem:[#allocation5 + $0x1f0] sm:$0xff]  ;;  %v193_v17 = vld [vmem:[#allocation5 + $0x98] sm:$0xff]  ;;  %s1171_s13 = smov [#allocation7]  }
  0x4e   : > { %276 = vmatprep.subr.mxu0 %v203_v5  ;;  %836 = vmatpush3.msra.mxu1 %v238_v15  ;;  %v192_v18 = vld [vmem:[#allocation5 + $0x90] sm:$0xff]  ;;  %v234_v19 = vld [vmem:[#allocation5 + $0x1e0] sm:$0xff]  ;;  %v191_v20 = vld [vmem:[#allocation5 + $0x88] sm:$0xff]  ;;  %p1095_p10 = pnand %p1094_p8, %p1457_p3  ;;  %s1097_s26 = sshll.u32 %s1171_s13, 4  ;;  %s1098_s26 = int_to_ptr.vmem [resolvable:$false] %s1097_s26 }
  0x4f   : > { %277 = vmatpush1.msra.mxu0 %v202_v6  ;;  %837 = vmatprep.subr.mxu1 %v1167_v0  ;;  %v190_v21 = vld [vmem:[#allocation5 + $0x80] sm:$0xff]  ;;  %v232_v22 = vld [vmem:[#allocation5 + $0x1d0] sm:$0xff]  ;;  %v189_v23 = vld [vmem:[#allocation5 + $0x78] sm:$0xff]  ;;  %s1099_s27 = scalar_lea.vmem %s1098_s26, 256  ;;  %p1100_p12 = scmp.lt.s32.totalorder %s674_s18, %s1098_s26 }
  0x50   : > { %278 = vmatprep.subr.mxu0 %v201_v7  ;;  %838 = vmatpush3.msra.mxu1 %v236_v16  ;;  %v188_v24 = vld [vmem:[#allocation5 + $0x70] sm:$0xff]  ;;  %v230_v25 = vld [vmem:[#allocation5 + $0x1c0] sm:$0xff]  ;;  %v187_v26 = vld [vmem:[#allocation5 + $0x68] sm:$0xff]  ;;  %p1096_p7 = pneg %p1095_p10  ;;  %p1101_p2 = scmp.lt.s32.totalorder %s1099_s27, %s1093_s25 }
  0x51   : > { %279 = vmatpush1.msra.mxu0 %v200_v8  ;;  %839 = vmatprep.subr.mxu1 %v1167_v0  ;;  %v186_v27 = vld [vmem:[#allocation5 + $0x60] sm:$0xff]  ;;  %v228_v28 = vld [vmem:[#allocation5 + $0x1b0] sm:$0xff]  ;;  %v185_v29 = vld [vmem:[#allocation5 + $0x58] sm:$0xff] }
  0x52   : > { %280 = vmatprep.subr.mxu0 %v199_v9  ;;  %840 = vmatpush3.msra.mxu1 %v234_v19  ;;  %v184_v30 = vld [vmem:[#allocation5 + $0x50] sm:$0xff]  ;;  %v226_v31 = vld [vmem:[#allocation5 + $0x1a0] sm:$0xff]  ;;  %v183_v32 = vld [vmem:[#allocation5 + $0x48] sm:$0xff]  ;;  %p1102_p13 = por %p1101_p2, %p1100_p12 }
  0x53   : > { %281 = vmatpush1.msra.mxu0 %v198_v10  ;;  %841 = vmatprep.subr.mxu1 %v1167_v0  ;;  %v182_v33 = vld [vmem:[#allocation5 + $0x40] sm:$0xff]  ;;  %v224_v34 = vld [vmem:[#allocation5 + $0x190] sm:$0xff]  ;;  %v181_v35 = vld [vmem:[#allocation5 + $0x38] sm:$0xff] }
  0x54   : > { %282 = vmatprep.subr.mxu0 %v197_v11  ;;  %842 = vmatpush3.msra.mxu1 %v232_v22  ;;  %v180_v36 = vld [vmem:[#allocation5 + $0x30] sm:$0xff]  ;;  %v222_v37 = vld [vmem:[#allocation5 + $0x180] sm:$0xff]  ;;  %v179_v38 = vld [vmem:[#allocation5 + $0x28] sm:$0xff]  ;;  %p1103_p0 = pnand %p1102_p13, %p1096_p7 }
  0x55   : > { %283 = vmatpush1.msra.mxu0 %v196_v12  ;;  %843 = vmatprep.subr.mxu1 %v1167_v0  ;;  %v178_v39 = vld [vmem:[#allocation5 + $0x20] sm:$0xff]  ;;  %v220_v40 = vld [vmem:[#allocation5 + $0x170] sm:$0xff]  ;;  %v177_v41 = vld [vmem:[#allocation5 + $0x18] sm:$0xff] }
  0x56   : > { %284 = vmatprep.subr.mxu0 %v195_v13  ;;  %844 = vmatpush3.msra.mxu1 %v230_v25  ;;  %v176_v42 = vld [vmem:[#allocation5 + $0x10] sm:$0xff]  ;;  %v218_v43 = vld [vmem:[#allocation5 + $0x160] sm:$0xff]  ;;  %v239_v50 = vld [vmem:[#allocation5 + $0x208] sm:$0xff] }
  0x57   : > { %285 = vmatpush1.msra.mxu0 %v194_v14  ;;  %845 = vmatprep.subr.mxu1 %v1167_v0  ;;  %v174_v44 = vld [vmem:[%s1299_s22] sm:$0xff]  ;;  %v214_v46 = vld [vmem:[#allocation5 + $0x140] sm:$0xff]  ;;  %v235_v52 = vld [vmem:[#allocation5 + $0x1e8] sm:$0xff] }
  0x58   : > { %286 = vmatprep.subr.mxu0 %v193_v17  ;;  %846 = vmatpush3.msra.mxu1 %v228_v28  ;;  %v216_v45 = vld [vmem:[#allocation5 + $0x150] sm:$0xff]  ;;  %v210_v48 = vld [vmem:[#allocation5 + $0x120] sm:$0xff]  ;;  %v237_v51 = vld [vmem:[#allocation5 + $0x1f8] sm:$0xff] }
  0x59   : > { %287 = vmatpush1.msra.mxu0 %v192_v18  ;;  %847 = vmatprep.subr.mxu1 %v1167_v0  ;;  %v212_v47 = vld [vmem:[#allocation5 + $0x130] sm:$0xff]  ;;  %v233_v53 = vld [vmem:[#allocation5 + $0x1d8] sm:$0xff]  ;;  %v231_v54 = vld [vmem:[#allocation5 + $0x1c8] sm:$0xff] }
  0x5a   : > { %288 = vmatprep.subr.mxu0 %v191_v20  ;;  %848 = vmatpush3.msra.mxu1 %v226_v31  ;;  %v208_v49 = vld [vmem:[#allocation5 + $0x110] sm:$0xff]  ;;  %v229_v55 = vld [vmem:[#allocation5 + $0x1b8] sm:$0xff]  ;;  %v227_v56 = vld [vmem:[#allocation5 + $0x1a8] sm:$0xff] }
  0x5b   : > { %289 = vmatpush1.msra.mxu0 %v190_v21  ;;  %849 = vmatprep.subr.mxu1 %v1167_v0  ;;  %v225_v57 = vld [vmem:[#allocation5 + $0x198] sm:$0xff]  ;;  %v223_v58 = vld [vmem:[#allocation5 + $0x188] sm:$0xff]  ;;  %v1349_v3 = vld [vmem:[#allocation5] sm:$0xff] }
  0x5c   : > { %290 = vmatprep.subr.mxu0 %v189_v23  ;;  %850 = vmatpush3.msra.mxu1 %v224_v34  ;;  %v221_v59 = vld [vmem:[#allocation5 + $0x178] sm:$0xff]  ;;  %v219_v60 = vld [vmem:[#allocation5 + $0x168] sm:$0xff]  ;;  %v346_v4 = vrot.slane %v1349_v3, %v345_v2  ;;  %v270_v11 = vld [vmem:[#allocation5 + $0x300] sm:$0xff]  ;;  %v351_v23 = vsub.s32 1, %v1346_v1  ;;  %v577_v2 = vsub.s32 4, %v1346_v1 }
  0x5d   : > { %291 = vmatpush1.msra.mxu0 %v188_v24  ;;  %851 = vmatprep.subr.mxu1 %v1167_v0  ;;  %v217_v61 = vld [vmem:[#allocation5 + $0x158] sm:$0xff]  ;;  %v215_v62 = vld [vmem:[#allocation5 + $0x148] sm:$0xff]  ;;  %v268_v12 = vld [vmem:[#allocation5 + $0x2f0] sm:$0xff] }
  0x5e   : > { %292 = vmatprep.subr.mxu0 %v187_v26  ;;  %852 = vmatpush3.msra.mxu1 %v222_v37  ;;  %v213_v8 = vld [vmem:[#allocation5 + $0x138] sm:$0xff]  ;;  %v211_v9 = vld [vmem:[#allocation5 + $0x128] sm:$0xff]  ;;  %v266_v13 = vld [vmem:[#allocation5 + $0x2e0] sm:$0xff]  ;;  %v352_v24 = vrot.slane %v1349_v3, %v351_v23 }
  0x5f   : > { %293 = vmatpush1.msra.mxu0 %v186_v27  ;;  %853 = vmatprep.subr.mxu1 %v1167_v0  ;;  %v209_v10 = vld [vmem:[#allocation5 + $0x118] sm:$0xff]  ;;  %v264_v14 = vld [vmem:[#allocation5 + $0x2d0] sm:$0xff]  ;;  %v262_v15 = vld [vmem:[#allocation5 + $0x2c0] sm:$0xff] }
  0x60   : > { %294 = vmatprep.subr.mxu0 %v185_v29  ;;  %854 = vmatpush3.msra.mxu1 %v220_v40  ;;  %v260_v16 = vld [vmem:[#allocation5 + $0x2b0] sm:$0xff]  ;;  %v258_v17 = vld [vmem:[#allocation5 + $0x2a0] sm:$0xff]  ;;  %v269_v34 = vld [vmem:[#allocation5 + $0x2f8] sm:$0xff] }
  0x61   : > { %295 = vmatpush1.msra.mxu0 %v184_v30  ;;  %855 = vmatprep.subr.mxu1 %v1167_v0  ;;  %v256_v18 = vld [vmem:[#allocation5 + $0x290] sm:$0xff]  ;;  %v254_v19 = vld [vmem:[#allocation5 + $0x280] sm:$0xff]  ;;  %v263_v37 = vld [vmem:[#allocation5 + $0x2c8] sm:$0xff] }
  0x62   : > { %296 = vmatprep.subr.mxu0 %v183_v32  ;;  %856 = vmatpush3.msra.mxu1 %v218_v43  ;;  %v252_v20 = vld [vmem:[#allocation5 + $0x270] sm:$0xff]  ;;  %v250_v21 = vld [vmem:[#allocation5 + $0x260] sm:$0xff]  ;;  %v257_v40 = vld [vmem:[#allocation5 + $0x298] sm:$0xff] }
  0x63   : > { %297 = vmatpush1.msra.mxu0 %v182_v33  ;;  %857 = vmatprep.subr.mxu1 %v1167_v0  ;;  %v248_v22 = vld [vmem:[#allocation5 + $0x250] sm:$0xff]  ;;  %v246_v29 = vld [vmem:[#allocation5 + $0x240] sm:$0xff]  ;;  %v271_v33 = vld [vmem:[#allocation5 + $0x308] sm:$0xff] }
  0x64   : > { %298 = vmatprep.subr.mxu0 %v181_v35  ;;  %858 = vmatpush3.msra.mxu1 %v216_v45  ;;  %v244_v30 = vld [vmem:[#allocation5 + $0x230] sm:$0xff]  ;;  %v242_v31 = vld [vmem:[#allocation5 + $0x220] sm:$0xff]  ;;  %v267_v35 = vld [vmem:[#allocation5 + $0x2e8] sm:$0xff] }
  0x65   : > { %299 = vmatpush1.msra.mxu0 %v180_v36  ;;  %859 = vmatprep.subr.mxu1 %v1167_v0  ;;  %v240_v32 = vld [vmem:[#allocation5 + $0x210] sm:$0xff]  ;;  %v265_v36 = vld [vmem:[#allocation5 + $0x2d8] sm:$0xff]  ;;  %v251_v43 = vld [vmem:[#allocation5 + $0x268] sm:$0xff] }
  0x66   : > { %300 = vmatprep.subr.mxu0 %v179_v38  ;;  %860 = vmatpush3.msra.mxu1 %v214_v46  ;;  %v261_v38 = vld [vmem:[#allocation5 + $0x2b8] sm:$0xff]  ;;  %v247_v45 = vld [vmem:[#allocation5 + $0x248] sm:$0xff]  ;;  %v426_v46 = vsub.s32 2, %v1346_v1 }
  0x67   : > { %301 = vmatpush1.msra.mxu0 %v178_v39  ;;  %861 = vmatprep.subr.mxu1 %v1167_v0  ;;  %v259_v39 = vld [vmem:[#allocation5 + $0x2a8] sm:$0xff] }
  0x68   : > { %302 = vmatprep.subr.mxu0 %v177_v41  ;;  %862 = vmatpush3.msra.mxu1 %v212_v47  ;;  %v255_v41 = vld [vmem:[#allocation5 + $0x288] sm:$0xff]  ;;  %v427_v47 = vrot.slane %v1349_v3, %v426_v46 }
  0x69   : > { %303 = vmatpush1.msra.mxu0 %v176_v42  ;;  %863 = vmatprep.subr.mxu1 %v1167_v0  ;;  %v253_v42 = vld [vmem:[#allocation5 + $0x278] sm:$0xff] }
  0x6a   : > { %337 = vmatmul.mubr.f32.vlgmr.msra.gmra.mxu0 %v174_v44  ;;  %870 = vmatprep.subr.mxu0 %v1167_v0  ;;  %v249_v44 = vld [vmem:[#allocation5 + $0x258] sm:$0xff] }
  0x6b   : > { %864 = vmatpush3.msra.mxu1 %v210_v48  ;;  %902 = vmatprep.mubr.msk.f32.mxu0 %vm1168_vm0, %v1167_v0 }
  0x6c   : > { %865 = vmatprep.subr.mxu1 %v1167_v0  ;;  %871 = vmatpush3.msra.mxu0 %v239_v50 }
  0x6d   : > { %866 = vmatpush3.msra.mxu1 %v208_v49  ;;  %872 = vmatprep.subr.mxu0 %v1167_v0 }
  0x6e   : > { %905 = vmatprep.subr.mxu1 %v1167_v0  ;;  %873 = vmatpush3.msra.mxu0 %v237_v51 }
  0x6f   : > { %874 = vmatprep.subr.mxu0 %v1167_v0 }
  0x70   : > { %875 = vmatpush3.msra.mxu0 %v235_v52 }
  0x71   : > { %876 = vmatprep.subr.mxu0 %v1167_v0 }
  0x72   : > { %877 = vmatpush3.msra.mxu0 %v233_v53 }
  0x73   : > { %878 = vmatprep.subr.mxu0 %v1167_v0 }
  0x74   : > { %879 = vmatpush3.msra.mxu0 %v231_v54  ;;  %v245_v54 = vld [vmem:[#allocation5 + $0x238] sm:$0xff] }
  0x75   : > { %880 = vmatprep.subr.mxu0 %v1167_v0 }
  0x76   : > { %881 = vmatpush3.msra.mxu0 %v229_v55  ;;  %v243_v55 = vld [vmem:[#allocation5 + $0x228] sm:$0xff] }
  0x77   : > { %882 = vmatprep.subr.mxu0 %v1167_v0 }
  0x78   : > { %883 = vmatpush3.msra.mxu0 %v227_v56  ;;  %v241_v56 = vld [vmem:[#allocation5 + $0x218] sm:$0xff] }
  0x79   : > { %884 = vmatprep.subr.mxu0 %v1167_v0 }
  0x7a   : > { %885 = vmatpush3.msra.mxu0 %v225_v57  ;;  %v502_v57 = vsub.s32 3, %v1346_v1 }
  0x7b   : > { %886 = vmatprep.subr.mxu0 %v1167_v0 }
  0x7c   : > { %887 = vmatpush3.msra.mxu0 %v223_v58  ;;  %v503_v58 = vrot.slane %v1349_v3, %v502_v57 }
  0x7d   : > { %888 = vmatprep.subr.mxu0 %v1167_v0 }
  0x7e   : > { %889 = vmatpush3.msra.mxu0 %v221_v59 }
  0x7f   : > { %890 = vmatprep.subr.mxu0 %v1167_v0 }
  0x80   : > { %891 = vmatpush3.msra.mxu0 %v219_v60 }
  0x81   : > { %892 = vmatprep.subr.mxu0 %v1167_v0 }
  0x82   : > { %893 = vmatpush3.msra.mxu0 %v217_v61 }
  0x83   : > { %894 = vmatprep.subr.mxu0 %v1167_v0 }
  0x84   : > { %895 = vmatpush3.msra.mxu0 %v215_v62 }
  0x85   : > { %896 = vmatprep.subr.mxu0 %v1167_v0 }
  0x86   : > { %897 = vmatpush3.msra.mxu0 %v213_v8 }
  0x87   : > { %898 = vmatprep.subr.mxu0 %v1167_v0 }
  0x88   : > { %899 = vmatpush3.msra.mxu0 %v211_v9 }
  0x89   : > { %900 = vmatprep.subr.mxu0 %v1167_v0 }
  0x8a   : > { %901 = vmatpush3.msra.mxu0 %v209_v10 }
  0x8b   : > { %940 = vmatprep.subr.mxu0 %v1167_v0 }
 0x12a   : > { %v338_v5 = vpop.f32.mrf.mxu0 }
 0x12b   : > { %v347_v6 = vadd.f32 %v346_v4, %v338_v5  ;;  %v578_v4 = vrot.slane %v1349_v3, %v577_v2 }
 0x12c   : > { %v340_v48 = vpop.f32.mrf.mxu0 }
 0x12d   : > { %v348_v7 = vmax.f32 %v347_v6, 0.0 }
 0x12f   : > { %868 = vmatmul.mubr.f32.vlgmr.msra.gmra.mxu1 %v348_v7 }
 0x130   : > { %937 = vmatprep.mubr.msk.f32.mxu1 %vm1168_vm0, %v1167_v0  ;;  %906 = vmatpush3.msra.mxu1 %v270_v11 }
 0x131   : > { %907 = vmatprep.subr.mxu1 %v1167_v0 }
 0x132   : > { %908 = vmatpush3.msra.mxu1 %v268_v12 }
 0x133   : > { %909 = vmatprep.subr.mxu1 %v1167_v0 }
 0x134   : > { %910 = vmatpush3.msra.mxu1 %v266_v13 }
 0x135   : > { %911 = vmatprep.subr.mxu1 %v1167_v0 }
 0x136   : > { %912 = vmatpush3.msra.mxu1 %v264_v14 }
 0x137   : > { %913 = vmatprep.subr.mxu1 %v1167_v0 }
 0x138   : > { %914 = vmatpush3.msra.mxu1 %v262_v15 }
 0x139   : > { %915 = vmatprep.subr.mxu1 %v1167_v0 }
 0x13a   : > { %916 = vmatpush3.msra.mxu1 %v260_v16 }
 0x13b   : > { %917 = vmatprep.subr.mxu1 %v1167_v0 }
 0x13c   : > { %918 = vmatpush3.msra.mxu1 %v258_v17 }
 0x13d   : > { %919 = vmatprep.subr.mxu1 %v1167_v0 }
 0x13e   : > { %920 = vmatpush3.msra.mxu1 %v256_v18 }
 0x13f   : > { %921 = vmatprep.subr.mxu1 %v1167_v0 }
 0x140   : > { %922 = vmatpush3.msra.mxu1 %v254_v19 }
 0x141   : > { %923 = vmatprep.subr.mxu1 %v1167_v0 }
 0x142   : > { %924 = vmatpush3.msra.mxu1 %v252_v20 }
 0x143   : > { %925 = vmatprep.subr.mxu1 %v1167_v0 }
 0x144   : > { %926 = vmatpush3.msra.mxu1 %v250_v21 }
 0x145   : > { %927 = vmatprep.subr.mxu1 %v1167_v0 }
 0x146   : > { %928 = vmatpush3.msra.mxu1 %v248_v22 }
 0x147   : > { %929 = vmatprep.subr.mxu1 %v1167_v0 }
 0x148   : > { %930 = vmatpush3.msra.mxu1 %v246_v29 }
 0x149   : > { %931 = vmatprep.subr.mxu1 %v1167_v0 }
 0x14a   : > { %932 = vmatpush3.msra.mxu1 %v244_v30 }
 0x14b   : > { %933 = vmatprep.subr.mxu1 %v1167_v0 }
 0x14c   : > { %934 = vmatpush3.msra.mxu1 %v242_v31 }
 0x14d   : > { %935 = vmatprep.subr.mxu1 %v1167_v0 }
 0x14e   : > { %936 = vmatpush3.msra.mxu1 %v240_v32 }
 0x1ef   : > { %v419_v25 = vpop.f32.mrf.mxu1 }
 0x1f0   : > { %v420_v26 = vadd.f32 %v419_v25, %v352_v24 }
 0x1f1   : > { %v869_v27 = vpop.f32.mrf.mxu1 }
 0x1f2   : > { %v423_v28 = vmax.f32 %v420_v26, 0.0 }
 0x1f4   : > { %903 = vmatmul.mubr.f32.vlgmr.msra.gmra.mxu0 %v423_v28 }
 0x1f5   : > { %972 = vmatprep.mubr.msk.f32.mxu0 %vm1168_vm0, %v1167_v0  ;;  %941 = vmatpush3.msra.mxu0 %v271_v33 }
 0x1f6   : > { %942 = vmatprep.subr.mxu0 %v1167_v0 }
 0x1f7   : > { %943 = vmatpush3.msra.mxu0 %v269_v34 }
 0x1f8   : > { %944 = vmatprep.subr.mxu0 %v1167_v0 }
 0x1f9   : > { %945 = vmatpush3.msra.mxu0 %v267_v35 }
 0x1fa   : > { %946 = vmatprep.subr.mxu0 %v1167_v0 }
 0x1fb   : > { %947 = vmatpush3.msra.mxu0 %v265_v36 }
 0x1fc   : > { %948 = vmatprep.subr.mxu0 %v1167_v0 }
 0x1fd   : > { %949 = vmatpush3.msra.mxu0 %v263_v37 }
 0x1fe   : > { %950 = vmatprep.subr.mxu0 %v1167_v0 }
 0x1ff   : > { %951 = vmatpush3.msra.mxu0 %v261_v38 }
 0x200   : > { %952 = vmatprep.subr.mxu0 %v1167_v0 }
 0x201   : > { %953 = vmatpush3.msra.mxu0 %v259_v39 }
 0x202   : > { %954 = vmatprep.subr.mxu0 %v1167_v0 }
 0x203   : > { %955 = vmatpush3.msra.mxu0 %v257_v40 }
 0x204   : > { %956 = vmatprep.subr.mxu0 %v1167_v0 }
 0x205   : > { %957 = vmatpush3.msra.mxu0 %v255_v41 }
 0x206   : > { %958 = vmatprep.subr.mxu0 %v1167_v0 }
 0x207   : > { %959 = vmatpush3.msra.mxu0 %v253_v42 }
 0x208   : > { %960 = vmatprep.subr.mxu0 %v1167_v0 }
 0x209   : > { %961 = vmatpush3.msra.mxu0 %v251_v43 }
 0x20a   : > { %962 = vmatprep.subr.mxu0 %v1167_v0 }
 0x20b   : > { %963 = vmatpush3.msra.mxu0 %v249_v44 }
 0x20c   : > { %964 = vmatprep.subr.mxu0 %v1167_v0 }
 0x20d   : > { %965 = vmatpush3.msra.mxu0 %v247_v45 }
 0x20e   : > { %966 = vmatprep.subr.mxu0 %v1167_v0 }
 0x20f   : > { %967 = vmatpush3.msra.mxu0 %v245_v54 }
 0x210   : > { %968 = vmatprep.subr.mxu0 %v1167_v0 }
 0x211   : > { %969 = vmatpush3.msra.mxu0 %v243_v55 }
 0x212   : > { %970 = vmatprep.subr.mxu0 %v1167_v0 }
 0x213   : > { %971 = vmatpush3.msra.mxu0 %v241_v56 }
 0x2b4   : > { %v494_v49 = vpop.f32.mrf.mxu0 }
 0x2b5   : > { %v495_v50 = vadd.f32 %v494_v49, %v427_v47 }
 0x2b6   : > { %v904_v51 = vpop.f32.mrf.mxu0 }
 0x2b7   : > { %v498_v52 = vadd.f32 %v495_v50, %v340_v48 }
 0x2b9   : > { %v499_v53 = vmax.f32 %v498_v52, 0.0 }
 0x2bb   : > { %938 = vmatmul.mubr.f32.vlgmr.msra.gmra.mxu1 %v499_v53 }
 0x37b   : > { %v570_v59 = vpop.f32.mrf.mxu1 }
 0x37c   : > { %v571_v60 = vadd.f32 %v570_v59, %v503_v58 }
 0x37d   : > { %v939_v61 = vpop.f32.mrf.mxu1 }
 0x37e   : > { %v574_v62 = vmax.f32 %v571_v60, 0.0 }
 0x380   : > { %973 = vmatmul.mubr.f32.vlgmr.msra.gmra.mxu0 %v574_v62 }
 0x440   : > { %v645_v0 = vpop.f32.mrf.mxu0 }
 0x441   : > { %v646_v5 = vadd.f32 %v645_v0, %v578_v4 }
 0x442   : > { %v974_v6 = vpop.f32.mrf.mxu0 }
 0x443   : > { %vm649_vm1 = vcmp.gt.f32.partialorder %v646_v5, 0.0 }
 0x444   : > { %v652_v7 = vsel %vm649_vm1, 1, %v1169_v63 }
 0x445   : > { %654 = vperm.xlu0 %1038, %v652_v7  }
 0x449   : > { %650 = vrot.lane.b32.xlu0 %v495_v50, %s1170_s15 }
 0x4c0   : > { %v655_v8 = vpop.permute.xlu0 %654 }
 0x4c1   : > { %vm656_vm2 = vcmp.eq.s32.totalorder %v655_v8, 1 }
 0x4c4   : > { %v651_v9 = vpop.permute.xlu0 %650 }
 0x4c5   : > { %v657_v1 = vsel %vm656_vm2, %v495_v50, %v651_v9 }
 0x4c6   : > { %658 = vst [vmem:[%s173_s8] sm:$0xff] %v657_v1 }
 0x4c7   : > { %1106 = shalt.err (!%p1103_p0)
}
 0x4c8   : > { %s1107_s28 = scalar_lea.hbm %s1403_s23, 128  ;;  %s1111_s5 = scalar_lea.hbm %s1441_s2, 384 }
 0x4c9   : > { %p1108_p5 = scmp.ne.s32.totalorder %s1403_s23, %s1107_s28  ;;  %p1112_p1 = scmp.lt.s32.totalorder %s1403_s23, %s1441_s2 }
 0x4ca   : > { %p1113_p4 = scmp.lt.s32.totalorder %s1111_s5, %s1107_s28 }
 0x4cb   : > { %p1109_p9 = pnand %p1108_p5, %p1457_p3 }
 0x4cc   : > { %p1114_p6 = por %p1113_p4, %p1112_p1 }
 0x4cd   : > { %p1110_p11 = pneg %p1109_p9 }
 0x4cf   : > { %p1115_p8 = pnand %p1114_p6, %p1110_p11 }
 0x4d1   : > { %1118 = shalt.err (!%p1115_p8)
}
 0x4d2   : > { %981 = dma.vmem_to_hbm [thread:$0]  (%p1457_p3), %s674_s18, 128, %s1403_s23, %s660_s24  }
 0x4d3 PF: > { %p998_p10 = scmp.ge.s32.totalorder %s1161_s12, 2  ;;  %s685_s14 = sand.u32 1, %s1149_s9  }
 0x4d4   : > { %p1458_p7 = scmp.ne.s32.totalorder %s1447_s16, 0  ;;  %s686_s22 = scalar_lea.sflag [#allocation4], %s685_s14 }
 0x4d6   : > { %p992_p12 = pnand %p998_p10, %p1458_p7 }
 0x4d8   : > { %p993_p2 = pneg %p992_p12 }
 0x4da   : > { %1144 = dma.done.wait (%p993_p2), %s686_s22, 128  }
 0x4db   : > { %1146 = vsyncadd (%p993_p2), %s686_s22, 4294967168  ;;  %p16_p13 = scmp.ge.s32.totalorder %s1240_s21, 5   ;;  %s1459_s9 = smov %s1153_s10 }
 0x4dc   : > { %s1460_s10 = smov %s1157_s11  ;;  %s1461_s11 = smov %s1257_s29 }
 0x4dd   : > { %s1462_s12 = smov %s1240_s21  ;;  %18 = sbr.rel (!%p16_p13) target bundleno = 6 (0x6), region = 77 }
 0x4e2   :  { %691 = vsyncpa [#allocation3], 1 }
 0x4e3   :  { %693 = vsyncpa [#allocation3 + $0x1], 1 }
 0x4e4   :  { %694 = vsyncpa [#allocation6], 1 }
 0x4e5   :  { %695 = vsyncpa [#allocation4], 1 }
 0x4e6   :  { %697 = vsyncpa [#allocation4 + $0x1], 1 }

</bundles_post_ra>
